<compile_context>
chip_gen: v5e
topology: v5e:2x2
jax: 0.10.0
libtpu: 0.0.40
codegen_flags: <defaults>
</compile_context>

<pallas_src>
import jax
import jax.numpy as jnp
from jax.experimental import pallas as pl
from jax.experimental.pallas import tpu as pltpu


def _round_up(a, b):
    return (a + b - 1) // b * b


# --------------------------------------------------------------------------
# Kernel body
# --------------------------------------------------------------------------
def _mlm_prediction_kernel(x_ref, w1_ref, b1_ref, w2_ref, b2_ref, o_ref, h_ref):
    # Hidden activations are computed once per row tile (at the first output
    # tile j == 0) into a compute-dtype VMEM scratch and reused for every
    # output tile j, so a vocab-sized fc never recomputes the projection and
    # each j>0 step loads a half-width (bf16) h.
    @pl.when(pl.program_id(1) == 0)
    def _():
        h = jnp.dot(x_ref[...], w1_ref[...], preferred_element_type=jnp.float32)
        h_ref[...] = jnp.tanh(h + b1_ref[...]).astype(h_ref.dtype)

    # TODO(synk): training-mode dropout (RNG mask) not implemented; eval = identity.
    out = jnp.dot(h_ref[...], w2_ref[...], preferred_element_type=jnp.float32)
    o_ref[...] = (out + b2_ref[...]).astype(o_ref.dtype)


# --------------------------------------------------------------------------
# Device tuning helpers (queries only; kernel execution is never wrapped in
# try/except)
# --------------------------------------------------------------------------
def _device_tuning():
    kind = ""
    try:
        kind = jax.devices()[0].device_kind.lower()
    except Exception:
        pass
    if "v7" in kind:
        # 2 TCs/chip, 64 MiB VMEM/TC, very high HBM BW -> moderate tiles.
        return dict(tm=512, tn=1024, lane_mult=256, num_tc=2,
                    vmem_default=64 << 20)
    if "v6" in kind:
        # 918 TF/s vs 1.4 TB/s -> needs the biggest row tile for W2 reuse.
        return dict(tm=1024, tn=2048, lane_mult=256, num_tc=1,
                    vmem_default=128 << 20)
    if "v5" in kind:
        return dict(tm=512, tn=2048, lane_mult=128, num_tc=1,
                    vmem_default=128 << 20)
    return dict(tm=512, tn=1024, lane_mult=128, num_tc=1,
                vmem_default=64 << 20)


def _vmem_capacity_bytes(default):
    try:
        cap = getattr(pltpu.get_tpu_info(), "vmem_capacity_bytes", None)
        if cap:
            return int(cap)
    except Exception:
        pass
    return default


def _vmem_footprint(tm, tn, Ep, Hp, cbytes, obytes):
    # Worst-case double-buffered footprint of one grid step.
    return (2 * tm * Ep * cbytes        # x tile
            + 2 * Ep * Hp * cbytes      # W1
            + 2 * Hp * 4                # b1 (f32)
            + 2 * Hp * tn * cbytes      # W2 tile
            + 2 * tn * 4                # b2 tile (f32)
            + 2 * tm * tn * obytes      # output tile
            + tm * Hp * cbytes)         # h scratch (compute dtype)


# --------------------------------------------------------------------------
# Weight preparation (do once at init): pad, cast, tile-contiguous W2 layout.
# --------------------------------------------------------------------------
def prepare_mlm_weights(w1, b1, w2, b2, *, tn=None,
                        compute_dtype=jnp.bfloat16, lane_mult=None):
    """Returns (params, meta) with padded/cast weights and tile metadata.

    Zero padding keeps the math exact:
      * padded E cols of x / rows of W1 contribute 0 to the first matmul,
      * padded H cols get b1 = 0 -> tanh(0) = 0, and the matching padded rows
        of W2 are 0, so they contribute 0 to the second matmul,
      * padded M rows / O cols are sliced off by the forward wrapper.
    """
    tune = _device_tuning()
    if lane_mult is None:
        lane_mult = tune["lane_mult"]        # 256 feeds v6e/v7x 256-wide MXU
    if tn is None:
        tn = tune["tn"]

    E, H = w1.shape
    H2, O = w2.shape
    assert H2 == H, "weight shapes must be (E,H) and (H,O)"

    Ep = _round_up(E, lane_mult)
    Hp = _round_up(H, lane_mult)
    tn_eff = min(_round_up(tn, lane_mult), _round_up(O, lane_mult))
    Op = _round_up(O, tn_eff)
    n_out_tiles = Op // tn_eff

    w1p = jnp.pad(w1.astype(compute_dtype), ((0, Ep - E), (0, Hp - H)))
    b1p = jnp.pad(b1.astype(jnp.float32), (0, Hp - H)).reshape(1, Hp)
    w2p = jnp.pad(w2.astype(compute_dtype), ((0, Hp - H), (0, Op - O)))
    # Tile-contiguous layout: (n_out_tiles, Hp, tn) -> each grid-j W2 block is
    # one contiguous DMA instead of Hp strided runs of tn*2 bytes.
    w2t = w2p.reshape(Hp, n_out_tiles, tn_eff).transpose(1, 0, 2)
    b2p = jnp.pad(b2.astype(jnp.float32), (0, Op - O)).reshape(1, Op)

    meta = dict(E=E, H=H, O=O, Ep=Ep, Hp=Hp, Op=Op, tn=tn_eff,
                lane_mult=lane_mult, compute_dtype=compute_dtype)
    return (w1p, b1p, w2t, b2p), meta


# --------------------------------------------------------------------------
# Forward pass with prepared weights
# --------------------------------------------------------------------------
def mlm_prediction_fwd(x, params, meta, *, tm=None, out_dtype=None):
    """x: (batch, seq, embedding_dim) -> (batch, seq, output_dim)."""
    w1p, b1p, w2t, b2p = params
    B, S, E = x.shape
    assert E == meta["E"], "x embedding dim must match prepared weights"
    M = B * S
    out_dtype = x.dtype if out_dtype is None else out_dtype

    tune = _device_tuning()
    if tm is None:
        tm = tune["tm"]

    cdt = meta["compute_dtype"]
    Ep, Hp, Op, tn_eff, O = meta["Ep"], meta["Hp"], meta["Op"], meta["tn"], meta["O"]
    cbytes = jnp.dtype(cdt).itemsize
    obytes = jnp.dtype(out_dtype).itemsize

    # Row tile: multiple of 16 (valid sublane packing for f32 and bf16).
    tm_eff = min(_round_up(tm, 16), _round_up(M, 16))

    # v7x: guarantee >= num_tc row tiles along the parallel axis so every
    # TensorCore gets work (the duplicated projection cost is tiny vs the fc).
    num_tc = tune["num_tc"]
    m16 = _round_up(M, 16)
    if num_tc > 1 and m16 >= 16 * num_tc and pl.cdiv(m16, tm_eff) < num_tc:
        tm_eff = _round_up(pl.cdiv(M, num_tc), 16)

    # VMEM budget: ~78% of physical capacity; shrink tm if the footprint of
    # the chosen tiling would not fit (never touches tn, which W2's layout
    # was prepared for).
    budget = int(_vmem_capacity_bytes(tune["vmem_default"]) * 0.78)
    while (_vmem_footprint(tm_eff, tn_eff, Ep, Hp, cbytes, obytes) > budget
           and tm_eff > 16):
        tm_eff = max(16, _round_up(tm_eff // 2, 16))

    Mp = _round_up(M, tm_eff)
    n_row_tiles = Mp // tm_eff
    grid = (n_row_tiles, Op // tn_eff)

    need = _vmem_footprint(tm_eff, tn_eff, Ep, Hp, cbytes, obytes)
    vmem_limit = int(min(max(need * 3 // 2 + (2 << 20), 32 << 20),
                         max(budget, need + (2 << 20))))

    # x cast/pad is per-call (x changes every call); weights were prepared once.
    x2d = jnp.pad(x.reshape(M, E).astype(cdt), ((0, Mp - M), (0, Ep - E)))

    cost = pl.CostEstimate(
        flops=2 * Mp * (Ep * Hp + Hp * Op),
        transcendentals=Mp * Hp,
        bytes_accessed=int(
            Mp * Ep * cbytes                      # x, read once
            + Ep * Hp * cbytes                    # W1, read once
            + Hp * Op * cbytes * n_row_tiles      # W2, re-streamed per row tile
            + (Hp + Op) * 4                       # biases
            + Mp * Op * obytes))                  # output writeback

    out2d = pl.pallas_call(
        _mlm_prediction_kernel,
        out_shape=jax.ShapeDtypeStruct((Mp, Op), out_dtype),
        grid_spec=pltpu.PrefetchScalarGridSpec(
            num_scalar_prefetch=0,
            grid=grid,
            in_specs=[
                pl.BlockSpec((tm_eff, Ep), lambda i, j: (i, 0)),      # x tile
                pl.BlockSpec((Ep, Hp), lambda i, j: (0, 0)),          # W1
                pl.BlockSpec((1, Hp), lambda i, j: (0, 0)),           # b1
                pl.BlockSpec((None, Hp, tn_eff),                      # W2 tile
                             lambda i, j: (j, 0, 0)),                 # (contiguous)
                pl.BlockSpec((1, tn_eff), lambda i, j: (0, j)),       # b2 tile
            ],
            out_specs=pl.BlockSpec((tm_eff, tn_eff), lambda i, j: (i, j)),
            scratch_shapes=[pltpu.VMEM((tm_eff, Hp), cdt)],           # h scratch
        ),
        compiler_params=pltpu.CompilerParams(
            dimension_semantics=("parallel", "arbitrary"),
            vmem_limit_bytes=vmem_limit,
        ),
        cost_estimate=cost,
    )(x2d, w1p, b1p, w2t, b2p)

    return out2d[:M, :O].reshape(B, S, O)


# --------------------------------------------------------------------------
# Convenience wrapper (prepare + forward in one call)
# --------------------------------------------------------------------------
def mlm_prediction_layer(x, w1, b1, w2, b2, *, tm=None, tn=None,
                         compute_dtype=jnp.bfloat16, out_dtype=None):
    params, meta = prepare_mlm_weights(w1, b1, w2, b2, tn=tn,
                                       compute_dtype=compute_dtype)
    return mlm_prediction_fwd(x, params, meta, tm=tm, out_dtype=out_dtype)


def _torch_linear_init(key, fan_in, fan_out, dtype=jnp.float32):
    """Deterministic init matching nn.Linear's U(-1/sqrt(in), 1/sqrt(in))."""
    kw, kb = jax.random.split(key)
    bound = 1.0 / jnp.sqrt(jnp.float32(fan_in))
    # stored as (in, out) so the kernel does x @ W
    w = jax.random.uniform(kw, (fan_in, fan_out), dtype, -bound, bound)
    b = jax.random.uniform(kb, (fan_out,), dtype, -bound, bound)
    return w, b


if __name__ == "__main__":
    # Small shapes consistent with the module's forward (non-128 dims to
    # exercise the padding path).
    batch, seq = 2, 8
    embedding_dim, hidden_dim, output_dim = 32, 48, 80
    dropout = 0.1  # identity at inference

    key = jax.random.PRNGKey(0)
    kx, k1, k2 = jax.random.split(key, 3)

    x = jax.random.normal(kx, (batch, seq, embedding_dim), jnp.float32)
    w1, b1 = _torch_linear_init(k1, embedding_dim, hidden_dim)   # projection
    w2, b2 = _torch_linear_init(k2, hidden_dim, output_dim)      # fc

    # Pure-JAX reference (dropout = identity at inference).
    ref = jnp.tanh(x @ w1 + b1) @ w2 + b2

    # 1) f32 compute path: validates tiling / padding / h-reuse tightly.
    out_f32 = jax.block_until_ready(
        mlm_prediction_layer(x, w1, b1, w2, b2, compute_dtype=jnp.float32))
    assert out_f32.shape == (batch, seq, output_dim)
    assert jnp.allclose(out_f32, ref, atol=1e-4, rtol=1e-4)

    # 2) default bf16-operand / f32-accumulation path using prepared weights
    #    (the production call pattern: pad/cast/re-layout done once at init).
    params, meta = prepare_mlm_weights(w1, b1, w2, b2)
    out_bf16 = jax.block_until_ready(mlm_prediction_fwd(x, params, meta))
    assert out_bf16.shape == (batch, seq, output_dim)
    assert jnp.allclose(out_bf16, ref, atol=5e-2, rtol=5e-2)

    # 3) multi-tile path: several row tiles and several output tiles so the
    #    h reuse across j and the tile-contiguous W2 layout are exercised.
    b3, s3, e3, h3, o3 = 2, 20, 32, 48, 300
    kx3, k13, k23 = jax.random.split(jax.random.PRNGKey(1), 3)
    x3 = jax.random.normal(kx3, (b3, s3, e3), jnp.float32)
    w13, b13 = _torch_linear_init(k13, e3, h3)
    w23, b23 = _torch_linear_init(k23, h3, o3)
    ref3 = jnp.tanh(x3 @ w13 + b13) @ w23 + b23
    out3 = jax.block_until_ready(
        mlm_prediction_layer(x3, w13, b13, w23, b23,
                             tm=16, tn=128, compute_dtype=jnp.float32))
    assert out3.shape == (b3, s3, o3)
    assert jnp.allclose(out3, ref3, atol=1e-4, rtol=1e-4)

    print("KERNEL_OK")
</pallas_src>

<mosaic_0001>
module attributes {stable_mosaic.version = 11 : i64} {
  func.func @_mlm_prediction_kernel(%arg0: i32, %arg1: i32, %arg2: memref<16x128xf32, #tpu.memory_space<vmem>>, %arg3: memref<128x128xf32, #tpu.memory_space<vmem>>, %arg4: memref<1x128xf32, #tpu.memory_space<vmem>>, %arg5: memref<1x128x128xf32, #tpu.memory_space<vmem>>, %arg6: memref<1x128xf32, #tpu.memory_space<vmem>>, %arg7: memref<16x128xf32, #tpu.memory_space<vmem>>, %arg8: memref<16x128xf32, #tpu.memory_space<vmem>>) attributes {dimension_semantics = [#tpu.dimension_semantics<parallel>, #tpu.dimension_semantics<arbitrary>], iteration_bounds = array<i64: 1, 1>, scalar_prefetch = 0 : i64, scratch_operands = 1 : i64, tpu.core_type = #tpu.core_type<tc>, window_params = [{transform_indices = @transform_0, window_bounds = array<i64: 16, 128>}, {pipeline_mode = #tpu.pipeline_mode<synchronous>, transform_indices = @transform_1, window_bounds = array<i64: 128, 128>}, {pipeline_mode = #tpu.pipeline_mode<synchronous>, transform_indices = @transform_2, window_bounds = array<i64: 1, 128>}, {transform_indices = @transform_3, window_bounds = array<i64: 1, 128, 128>}, {transform_indices = @transform_4, window_bounds = array<i64: 1, 128>}, {transform_indices = @transform_5, window_bounds = array<i64: 16, 128>}]} {
    %c0_i32 = arith.constant 0 : i32
    %0 = arith.cmpi eq, %arg1, %c0_i32 : i32
    %1 = arith.extui %0 : i1 to i32
    %c0_i32_0 = arith.constant 0 : i32
    %2 = arith.cmpi ne, %1, %c0_i32_0 : i32
    scf.if %2 {
      %c0_9 = arith.constant 0 : index
      %c0_10 = arith.constant 0 : index
      %11 = vector.load %arg2[%c0_9, %c0_10] : memref<16x128xf32, #tpu.memory_space<vmem>>, vector<16x128xf32>
      %c0_11 = arith.constant 0 : index
      %c0_12 = arith.constant 0 : index
      %12 = vector.load %arg3[%c0_11, %c0_12] : memref<128x128xf32, #tpu.memory_space<vmem>>, vector<128x128xf32>
      %cst_13 = arith.constant dense<0.000000e+00> : vector<16x128xf32>
      %13 = tpu.matmul %11, %12, %cst_13 {dimension_numbers = #tpu.dot_dimension_numbers<[1], [0], [0], [1], [0, 0, 1, 1], [], []>} : vector<16x128xf32>, vector<128x128xf32>, vector<16x128xf32> -> vector<16x128xf32>
      %c0_14 = arith.constant 0 : index
      %c0_15 = arith.constant 0 : index
      %14 = vector.load %arg4[%c0_14, %c0_15] : memref<1x128xf32, #tpu.memory_space<vmem>>, vector<1x128xf32>
      %15 = vector.broadcast %14 : vector<1x128xf32> to vector<16x128xf32>
      %16 = arith.addf %13, %15 : vector<16x128xf32>
      %17 = math.tanh %16 : vector<16x128xf32>
      %c0_16 = arith.constant 0 : index
      %c0_17 = arith.constant 0 : index
      %18 = vector.load %arg8[%c0_16, %c0_17] : memref<16x128xf32, #tpu.memory_space<vmem>>, vector<16x128xf32>
      tpu.vector_store %arg8[%c0_16, %c0_17], %17 {strides = array<i32>} : memref<16x128xf32, #tpu.memory_space<vmem>>, vector<16x128xf32>,
    } else {
    }
    %c0 = arith.constant 0 : index
    %c0_1 = arith.constant 0 : index
    %3 = vector.load %arg8[%c0, %c0_1] : memref<16x128xf32, #tpu.memory_space<vmem>>, vector<16x128xf32>
    %c0_2 = arith.constant 0 : index
    %c0_3 = arith.constant 0 : index
    %c0_4 = arith.constant 0 : index
    %4 = vector.load %arg5[%c0_2, %c0_3, %c0_4] : memref<1x128x128xf32, #tpu.memory_space<vmem>>, vector<1x128x128xf32>
    %5 = vector.shape_cast %4 : vector<1x128x128xf32> to vector<128x128xf32>
    %cst = arith.constant dense<0.000000e+00> : vector<16x128xf32>
    %6 = tpu.matmul %3, %5, %cst {dimension_numbers = #tpu.dot_dimension_numbers<[1], [0], [0], [1], [0, 0, 1, 1], [], []>} : vector<16x128xf32>, vector<128x128xf32>, vector<16x128xf32> -> vector<16x128xf32>
    %c0_5 = arith.constant 0 : index
    %c0_6 = arith.constant 0 : index
    %7 = vector.load %arg6[%c0_5, %c0_6] : memref<1x128xf32, #tpu.memory_space<vmem>>, vector<1x128xf32>
    %8 = vector.broadcast %7 : vector<1x128xf32> to vector<16x128xf32>
    %9 = arith.addf %6, %8 : vector<16x128xf32>
    %c0_7 = arith.constant 0 : index
    %c0_8 = arith.constant 0 : index
    %10 = vector.load %arg7[%c0_7, %c0_8] : memref<16x128xf32, #tpu.memory_space<vmem>>, vector<16x128xf32>
    tpu.vector_store %arg7[%c0_7, %c0_8], %9 {strides = array<i32>} : memref<16x128xf32, #tpu.memory_space<vmem>>, vector<16x128xf32>,
    return
  }
  func.func @transform_0(%arg0: i32, %arg1: i32) -> (i32, i32) {
    %c0_i32 = arith.constant 0 : i32
    %c0_i32_0 = arith.constant 0 : i32
    return %arg0, %c0_i32 : i32, i32
  }
  func.func @transform_1(%arg0: i32, %arg1: i32) -> (i32, i32) {
    %c0_i32 = arith.constant 0 : i32
    %c0_i32_0 = arith.constant 0 : i32
    %c0_i32_1 = arith.constant 0 : i32
    return %c0_i32, %c0_i32_0 : i32, i32
  }
  func.func @transform_2(%arg0: i32, %arg1: i32) -> (i32, i32) {
    %c0_i32 = arith.constant 0 : i32
    %c0_i32_0 = arith.constant 0 : i32
    %c0_i32_1 = arith.constant 0 : i32
    return %c0_i32, %c0_i32_0 : i32, i32
  }
  func.func @transform_3(%arg0: i32, %arg1: i32) -> (i32, i32, i32) {
    %c0_i32 = arith.constant 0 : i32
    %c0_i32_0 = arith.constant 0 : i32
    %c0_i32_1 = arith.constant 0 : i32
    return %arg1, %c0_i32, %c0_i32_0 : i32, i32, i32
  }
  func.func @transform_4(%arg0: i32, %arg1: i32) -> (i32, i32) {
    %c0_i32 = arith.constant 0 : i32
    %c0_i32_0 = arith.constant 0 : i32
    return %c0_i32, %arg1 : i32, i32
  }
  func.func @transform_5(%arg0: i32, %arg1: i32) -> (i32, i32) {
    %c0_i32 = arith.constant 0 : i32
    return %arg0, %arg1 : i32, i32
  }
}

</mosaic_0001>

<bundles_post_ra>
// kernel: tpu_custom_call.1
= control target key start
LH: loop header
LB: loop body
LE: loop exit
PB: predicated region body
PF: predicated region fallthrough
CT: control target
= control target key end

     0   :  { %10 = vsyncpa [#allocation4], 0  ;;  %s400_s0 = inlined_call_operand.hbm [shape: f32[16,128], index: 0, kind: input, shape index: {}]   ;;  %s401_s1 = inlined_call_operand.hbm [shape: f32[128,128], index: 1, kind: input, shape index: {}]   ;;  %s402_s2 = inlined_call_operand.vmem [shape: f32[1,128], index: 2, kind: input, shape index: {}]   ;;  %s403_s3 = inlined_call_operand.hbm [shape: f32[1,128,128], index: 3, kind: input, shape index: {}]   ;;  %s404_s4 = inlined_call_operand.vmem [shape: f32[1,128], index: 4, kind: input, shape index: {}]   ;;  %s405_s5 = inlined_call_operand.hbm [shape: f32[16,128], index: 5, kind: output, shape index: {}]  }
   0x1   :  { %11 = vsyncpa [#allocation7], 0 }
   0x2   :  { %12 = vsyncpa [#allocation5], 0  ;;  %s30_s20 = sshll.u32 %s401_s1, 4  ;;  %s334_s21 = smov [#allocation6]   ;;  %s31_s20 = int_to_ptr.hbm [resolvable:$true] %s30_s20 }
   0x3   :  { %s32_s22 = sshll.u32 %s334_s21, 4  ;;  %s17_s25 = sshll.u32 %s400_s0, 4  ;;  %s33_s22 = int_to_ptr.vmem [resolvable:$true] %s32_s22  ;;  %s18_s25 = int_to_ptr.hbm [resolvable:$true] %s17_s25 }
   0x4   :  { %s335_s26 = smov 128   ;;  %s336_s27 = smov 8  }
   0x5   :  { %38 = dma.hbm_to_vmem [thread:$0]  %s31_s20, 2048, %s33_s22, [#allocation7], %s335_s26, %s335_s26, %s336_s27  }
   0x6   :  { %s337_s28 = smov [#allocation3]   ;;  %s45_s1 = sshll.u32 %s403_s3, 4  ;;  %s46_s1 = int_to_ptr.hbm [resolvable:$true] %s45_s1 }
   0x7   :  { %s19_s29 = sshll.u32 %s337_s28, 4  ;;  %s338_s0 = smov [#allocation8]   ;;  %s20_s29 = int_to_ptr.vmem [resolvable:$true] %s19_s29 }
   0x8   :  { %25 = dma.hbm_to_vmem [thread:$0]  %s18_s25, 256, %s20_s29, [#allocation4], %s335_s26, %s335_s26, %s336_s27  }
   0x9   :  { %s47_s7 = sshll.u32 %s338_s0, 4  ;;  %s48_s7 = int_to_ptr.vmem [resolvable:$true] %s47_s7 }
   0xa   :  { %53 = dma.hbm_to_vmem [thread:$0]  %s46_s1, 2048, %s48_s7, [#allocation7], %s335_s26, %s335_s26, %s336_s27  }
   0xb   :  { %328 = dma.done.wait [#allocation4], 256  }
   0xc   :  { %329 = vsyncadd [#allocation4], 4294967040 }
   0xd   :  { %330 = dma.done.wait [#allocation7], 4096  }
   0xe   :  { %331 = vsyncadd [#allocation7], 4294963200  ;;  %v89_v0 = vld [vmem:[#allocation6 + $0x78] sm:$0xff]  ;;  %v88_v1 = vld [vmem:[#allocation6 + $0x70] sm:$0xff]  ;;  %s339_s11 = smov [#allocation9]   ;;  %s174_s14 = sshll.u32 %s405_s5, 4  ;;  %s175_s14 = int_to_ptr.hbm [resolvable:$true] %s174_s14 }
   0xf   :  { %188 = vmatpush.msra.mxu2 %v89_v0  ;;  %94 = vmatpush.msra.mxu0 %v89_v0  ;;  %v87_v2 = vld [vmem:[#allocation6 + $0x68] sm:$0xff]  ;;  %v86_v3 = vld [vmem:[#allocation6 + $0x60] sm:$0xff]  ;;  %v85_v4 = vld [vmem:[#allocation6 + $0x58] sm:$0xff]  ;;  %s172_s12 = sshll.u32 %s339_s11, 4  ;;  %s173_s12 = int_to_ptr.vmem [resolvable:$true] %s172_s12 }
  0x10   :  { %v138_v5 = vld [vmem:[#allocation8 + $0x78] sm:$0xff]  ;;  %v137_v6 = vld [vmem:[#allocation8 + $0x70] sm:$0xff]  ;;  %v136_v8 = vld [vmem:[#allocation8 + $0x68] sm:$0xff] }
  0x11   :  { %189 = vmatpush.msra.mxu2 %v88_v1  ;;  %95 = vmatpush.msra.mxu0 %v88_v1  ;;  %v84_v7 = vld [vmem:[#allocation6 + $0x50] sm:$0xff]  ;;  %v83_v9 = vld [vmem:[#allocation6 + $0x48] sm:$0xff]  ;;  %v135_v10 = vld [vmem:[#allocation8 + $0x60] sm:$0xff] }
  0x12   :  { %204 = vmatpush.msra.mxu3 %v138_v5  ;;  %143 = vmatpush.msra.mxu1 %v138_v5  ;;  %v82_v11 = vld [vmem:[#allocation6 + $0x40] sm:$0xff]  ;;  %v134_v12 = vld [vmem:[#allocation8 + $0x58] sm:$0xff]  ;;  %v133_v14 = vld [vmem:[#allocation8 + $0x50] sm:$0xff] }
  0x13   :  { %190 = vmatpush.msra.mxu2 %v87_v2  ;;  %96 = vmatpush.msra.mxu0 %v87_v2  ;;  %v81_v13 = vld [vmem:[#allocation6 + $0x38] sm:$0xff]  ;;  %v80_v15 = vld [vmem:[#allocation6 + $0x30] sm:$0xff]  ;;  %v132_v16 = vld [vmem:[#allocation8 + $0x48] sm:$0xff] }
  0x14   :  { %205 = vmatpush.msra.mxu3 %v137_v6  ;;  %144 = vmatpush.msra.mxu1 %v137_v6  ;;  %v79_v17 = vld [vmem:[#allocation6 + $0x28] sm:$0xff]  ;;  %v131_v18 = vld [vmem:[#allocation8 + $0x40] sm:$0xff]  ;;  %v130_v20 = vld [vmem:[#allocation8 + $0x38] sm:$0xff] }
  0x15   :  { %191 = vmatpush.msra.mxu2 %v86_v3  ;;  %97 = vmatpush.msra.mxu0 %v86_v3  ;;  %v78_v19 = vld [vmem:[#allocation6 + $0x20] sm:$0xff]  ;;  %v77_v21 = vld [vmem:[#allocation6 + $0x18] sm:$0xff]  ;;  %v129_v22 = vld [vmem:[#allocation8 + $0x30] sm:$0xff] }
  0x16   :  { %206 = vmatpush.msra.mxu3 %v136_v8  ;;  %145 = vmatpush.msra.mxu1 %v136_v8  ;;  %v76_v23 = vld [vmem:[#allocation6 + $0x10] sm:$0xff]  ;;  %v128_v24 = vld [vmem:[#allocation8 + $0x28] sm:$0xff]  ;;  %v74_v26 = vld [vmem:[#allocation6] sm:$0xff] }
  0x17   :  { %192 = vmatpush.msra.mxu2 %v85_v4  ;;  %98 = vmatpush.msra.mxu0 %v85_v4  ;;  %v75_v25 = vld [vmem:[#allocation6 + $0x8] sm:$0xff]  ;;  %v73_v27 = vld [vmem:[#allocation3 + $0x8] sm:$0xff]  ;;  %v72_v28 = vld [vmem:[#allocation3] sm:$0xff] }
  0x18   :  { %207 = vmatpush.msra.mxu3 %v135_v10  ;;  %146 = vmatpush.msra.mxu1 %v135_v10  ;;  %v127_v29 = vld [vmem:[#allocation8 + $0x20] sm:$0xff]  ;;  %v126_v30 = vld [vmem:[#allocation8 + $0x18] sm:$0xff]  ;;  %v125_v31 = vld [vmem:[#allocation8 + $0x10] sm:$0xff] }
  0x19   :  { %193 = vmatpush.msra.mxu2 %v84_v7  ;;  %99 = vmatpush.msra.mxu0 %v84_v7  ;;  %v124_v32 = vld [vmem:[#allocation8 + $0x8] sm:$0xff]  ;;  %v123_v33 = vld [vmem:[#allocation8] sm:$0xff]  ;;  %v226_v34 = vld [vmem:[%s402_s2] ss:$0 sm:$0xff] }
  0x1a   :  { %208 = vmatpush.msra.mxu3 %v134_v12  ;;  %147 = vmatpush.msra.mxu1 %v134_v12  ;;  %v227_v41 = vld [vmem:[%s404_s4] ss:$0 sm:$0xff] }
  0x1b   :  { %194 = vmatpush.msra.mxu2 %v83_v9  ;;  %100 = vmatpush.msra.mxu0 %v83_v9 }
  0x1c   :  { %209 = vmatpush.msra.mxu3 %v133_v14  ;;  %148 = vmatpush.msra.mxu1 %v133_v14 }
  0x1d   :  { %195 = vmatpush.msra.mxu2 %v82_v11  ;;  %101 = vmatpush.msra.mxu0 %v82_v11 }
  0x1e   :  { %210 = vmatpush.msra.mxu3 %v132_v16  ;;  %149 = vmatpush.msra.mxu1 %v132_v16 }
  0x1f   :  { %196 = vmatpush.msra.mxu2 %v81_v13  ;;  %102 = vmatpush.msra.mxu0 %v81_v13 }
  0x20   :  { %211 = vmatpush.msra.mxu3 %v131_v18  ;;  %150 = vmatpush.msra.mxu1 %v131_v18 }
  0x21   :  { %197 = vmatpush.msra.mxu2 %v80_v15  ;;  %103 = vmatpush.msra.mxu0 %v80_v15 }
  0x22   :  { %212 = vmatpush.msra.mxu3 %v130_v20  ;;  %151 = vmatpush.msra.mxu1 %v130_v20 }
  0x23   :  { %198 = vmatpush.msra.mxu2 %v79_v17  ;;  %104 = vmatpush.msra.mxu0 %v79_v17 }
  0x24   :  { %213 = vmatpush.msra.mxu3 %v129_v22  ;;  %152 = vmatpush.msra.mxu1 %v129_v22 }
  0x25   :  { %199 = vmatpush.msra.mxu2 %v78_v19  ;;  %105 = vmatpush.msra.mxu0 %v78_v19 }
  0x26   :  { %214 = vmatpush.msra.mxu3 %v128_v24  ;;  %153 = vmatpush.msra.mxu1 %v128_v24 }
  0x27   :  { %200 = vmatpush.msra.mxu2 %v77_v21  ;;  %106 = vmatpush.msra.mxu0 %v77_v21 }
  0x28   :  { %215 = vmatpush.msra.mxu3 %v127_v29  ;;  %154 = vmatpush.msra.mxu1 %v127_v29 }
  0x29   :  { %201 = vmatpush.msra.mxu2 %v76_v23  ;;  %107 = vmatpush.msra.mxu0 %v76_v23 }
  0x2a   :  { %216 = vmatpush.msra.mxu3 %v126_v30  ;;  %155 = vmatpush.msra.mxu1 %v126_v30 }
  0x2b   :  { %202 = vmatpush.msra.mxu2 %v75_v25  ;;  %108 = vmatpush.msra.mxu0 %v75_v25 }
  0x2c   :  { %217 = vmatpush.msra.mxu3 %v125_v31  ;;  %156 = vmatpush.msra.mxu1 %v125_v31 }
  0x2d   :  { %203 = vmatpush.msra.mxu2 %v74_v26  ;;  %109 = vmatpush.msra.mxu0 %v74_v26 }
  0x2e   :  { %113 = vmatmul.f32.vlgmr.msra.gmra.mxu2 %v73_v27  ;;  %110 = vmatmul.f32.vlgmr.msra.gmra.mxu0 %v72_v28 }
  0x2f   :  { %218 = vmatpush.msra.mxu3 %v124_v32  ;;  %157 = vmatpush.msra.mxu1 %v124_v32 }
  0x31   :  { %219 = vmatpush.msra.mxu3 %v123_v33  ;;  %158 = vmatpush.msra.mxu1 %v123_v33 }
  0xab   :  { %v111_v35 = vpop.f32.mrf.mxu0 }
  0xac   :  { %v112_v36 = vadd.f32 %v226_v34, %v111_v35 }
  0xae   :  { %228 = vtanh.f32 %v112_v36 }
  0xb1   :  { %v114_v37 = vpop.f32.mrf.mxu2 }
  0xb2   :  { %v115_v38 = vadd.f32 %v226_v34, %v114_v37 }
  0xb4   :  { %v229_v39 = vpop.eup %228  ;;  %230 = vtanh.f32 %v115_v38 }
  0xb5   :  { %159 = vmatmul.f32.vlgmr.msra.gmra.mxu1 %v229_v39 }
  0xba   :  { %v231_v40 = vpop.eup %230 }
  0xbb   :  { %162 = vmatmul.f32.vlgmr.msra.gmra.mxu3 %v231_v40 }
 0x132   :  { %v160_v42 = vpop.f32.mrf.mxu1 }
 0x133   :  { %v161_v43 = vadd.f32 %v227_v41, %v160_v42 }
 0x135   :  { %166 = vst [vmem:[#allocation9] sm:$0xff] %v161_v43 }
 0x13e   :  { %v163_v44 = vpop.f32.mrf.mxu3 }
 0x13f   :  { %v164_v45 = vadd.f32 %v227_v41, %v163_v44 }
 0x141   :  { %167 = vst [vmem:[#allocation9 + $0x8] sm:$0xff] %v164_v45 }
 0x142   :  { %180 = dma.vmem_to_hbm [thread:$0]  %s173_s12, 256, %s175_s14, [#allocation5], %s335_s26, %s335_s26, %s336_s27  }
 0x143   :  { %332 = dma.done.wait [#allocation5], 256  }
 0x144   :  { %333 = vsyncadd [#allocation5], 4294967040 }
 0x145   :  { %185 = vsyncpa [#allocation4], 1 }
 0x146   :  { %186 = vsyncpa [#allocation7], 1 }
 0x147   :  { %187 = vsyncpa [#allocation5], 1 }

</bundles_post_ra>
